<compile_context>
chip_gen: v5e
topology: v5e:2x2
jax: 0.10.0
libtpu: 0.0.40
codegen_flags: <defaults>
</compile_context>

<pallas_src>
import functools

import jax
import jax.numpy as jnp
from jax.experimental import pallas as pl
from jax.experimental.pallas import tpu as pltpu


def _round_up(x, m):
    return (x + m - 1) // m * m


def _vmem_limit_bytes():
    """~85% of per-core VMEM (headroom for Mosaic scratch / semaphores)."""
    cap = 64 * 1024 * 1024  # conservative default = v7x per-TensorCore VMEM
    try:
        info = pltpu.get_tpu_info()
        c = getattr(info, "vmem_capacity_bytes", None)
        if c:
            cap = int(c)
    except Exception:
        pass
    return int(cap * 0.85)


def _largest_tile(total, cap, mult):
    """Largest divisor of `total` that is a multiple of `mult` and <= cap, or None."""
    t = (min(cap, total) // mult) * mult
    while t >= mult:
        if total % t == 0:
            return t
        t -= mult
    return None


# --------------------------------------------------------------------------
# Kernels
# --------------------------------------------------------------------------
def _head_kernel_single_k(x_ref, w_ref, b_ref, o_ref, *, cd):
    # (TM, nf) @ (nf, TN) on the MXU, f32 accumulation, broadcast bias row.
    x = x_ref[...]
    if cd is not None:
        x = x.astype(cd)          # per-tile VPU cast, hidden under the MXU
    acc = jnp.dot(x, w_ref[...], preferred_element_type=jnp.float32)
    o_ref[...] = (acc + b_ref[...]).astype(o_ref.dtype)


def _head_kernel_k_split(x_ref, w_ref, b_ref, o_ref, acc_ref, *, cd):
    k = pl.program_id(2)

    @pl.when(k == 0)
    def _():
        acc_ref[...] = jnp.zeros_like(acc_ref)

    x = x_ref[...]
    if cd is not None:
        x = x.astype(cd)
    acc_ref[...] += jnp.dot(x, w_ref[...], preferred_element_type=jnp.float32)

    @pl.when(k == pl.num_programs(2) - 1)
    def _():
        o_ref[...] = (acc_ref[...] + b_ref[...]).astype(o_ref.dtype)


# --------------------------------------------------------------------------
# One-time parameter preparation (hoist out of the per-forward path)
# --------------------------------------------------------------------------
def prepare_flatten_head_params(weight, bias, *, compute_dtype=None):
    """weight: [target_window, nf] (PyTorch nn.Linear layout), bias: [target_window].

    Returns (w_t, b2, tw):
      w_t : (nf, TWp) transposed weight, columns zero-padded to a 128 multiple,
            optionally cast to compute_dtype (e.g. bf16) — done ONCE here.
      b2  : (1, TWp) f32 bias, zero-padded.
      tw  : true target_window.
    """
    tw, nf = weight.shape
    TWp = _round_up(tw, 128)
    w_t = weight.T
    b2 = bias.astype(jnp.float32).reshape(1, tw)
    if TWp != tw:
        w_t = jnp.pad(w_t, ((0, 0), (0, TWp - tw)))
        b2 = jnp.pad(b2, ((0, 0), (0, TWp - tw)))
    if compute_dtype is not None:
        w_t = w_t.astype(compute_dtype)
    return w_t, b2, tw


# --------------------------------------------------------------------------
# Forward
# --------------------------------------------------------------------------
def flatten_head_forward(x, params, *, compute_dtype=None,
                         tm_cap=1024, tn_cap=512, tk_cap=2048):
    """x: [B, n_vars, d_model, patch_num]; params from prepare_flatten_head_params.

    compute_dtype: optional MXU operand dtype (e.g. jnp.bfloat16); activations
    are cast per-tile inside the kernel, accumulation stays f32. Recommended
    for inference on v5e / v6e / v7x (halves weight DMA, bf16 MXU rate).
    Dropout(head_dropout) is identity in eval / p=0 -> nothing to implement.
    """
    w_t, b2, tw = params
    B, n_vars, d_model, patch_num = x.shape
    nf = d_model * patch_num
    assert w_t.shape[0] == nf, "nf mismatch between x and prepared weight"
    TWp = w_t.shape[1]
    M = B * n_vars
    out_dtype = x.dtype
    x_flat = x.reshape(M, nf)     # Flatten(-2) + merge leading batch dims

    # ---- K (contraction) tile ---------------------------------------------
    if nf <= tk_cap:
        tk = nf
    else:
        tk = _largest_tile(nf, tk_cap, 128)
        if tk is None:
            # TODO(synk): nf has no 128-multiple divisor <= tk_cap; fall back
            # to a single full-nf K step (correct, just larger VMEM tiles).
            tk = nf
    gk = nf // tk
    multi_k = gk > 1

    # ---- N tile: 128-multiple divisor of TWp (lane-dense, unmasked stores) --
    tn = _largest_tile(TWp, tn_cap, 128) or TWp

    # ---- Row tile sized from the per-chip VMEM budget -----------------------
    vmem_limit = _vmem_limit_bytes()
    budget = int(vmem_limit * 0.85)
    x_item = x_flat.dtype.itemsize
    w_item = w_t.dtype.itemsize
    o_item = jnp.dtype(out_dtype).itemsize
    fixed = 2 * tk * tn * w_item + 2 * tn * 4          # dbl-buffered weight + bias
    per_row = 2 * tk * x_item + 2 * tn * o_item + (tn * 4 if multi_k else 0)
    tm_budget = max(8, (budget - fixed) // max(per_row, 1))
    tm_cap = max(8, min(tm_cap, tm_budget))

    # Prefer no padding: tm = M (full dim) or a multiple-of-8 divisor of M.
    pad_rows = False
    if M <= tm_cap:
        tm = M
    else:
        tm = _largest_tile(M, tm_cap, 8)
        if tm is None:
            tm = (tm_cap // 8) * 8
            pad_rows = True
    Mp = _round_up(M, tm)
    if pad_rows and Mp != M:
        x_flat = jnp.pad(x_flat, ((0, Mp - M), (0, 0)))

    gi, gj = Mp // tm, TWp // tn

    # Keep >= 2 programs on a parallel axis so both v7x TensorCores get work.
    if gi * gj == 1:
        if (not pad_rows) and M >= 16:
            t2 = _largest_tile(M, M // 2, 8)
            if t2 is not None:
                tm = t2
                gi = M // tm
        if gi * gj == 1 and TWp >= 256:
            t2 = _largest_tile(TWp, TWp // 2, 128)
            if t2 is not None:
                tn = t2
                gj = TWp // tn

    # ---- Cost estimate (advisory) -------------------------------------------
    x_bytes = x_flat.size * x_item
    w_bytes = w_t.size * w_item
    cost = pl.CostEstimate(
        flops=2 * M * nf * tw,
        transcendentals=0,
        bytes_accessed=(x_bytes * (gj if multi_k else 1)   # x resident across j if single-K
                        + w_bytes * gi
                        + Mp * TWp * o_item
                        + b2.size * 4 * gi),
    )

    compiler_params = pltpu.CompilerParams(
        dimension_semantics=(("parallel", "parallel", "arbitrary") if multi_k
                             else ("parallel", "parallel")),
        vmem_limit_bytes=vmem_limit,
    )

    if multi_k:
        kernel = functools.partial(_head_kernel_k_split, cd=compute_dtype)
        grid_spec = pltpu.PrefetchScalarGridSpec(
            num_scalar_prefetch=0,
            grid=(gi, gj, gk),
            in_specs=[
                pl.BlockSpec((tm, tk), lambda i, j, k: (i, k)),   # x tile
                pl.BlockSpec((tk, tn), lambda i, j, k: (k, j)),   # weight tile
                pl.BlockSpec((1, tn), lambda i, j, k: (0, j)),    # bias slice
            ],
            out_specs=pl.BlockSpec((tm, tn), lambda i, j, k: (i, j)),
            scratch_shapes=[pltpu.VMEM((tm, tn), jnp.float32)],
        )
    else:
        kernel = functools.partial(_head_kernel_single_k, cd=compute_dtype)
        grid_spec = pltpu.PrefetchScalarGridSpec(
            num_scalar_prefetch=0,
            grid=(gi, gj),
            in_specs=[
                pl.BlockSpec((tm, nf), lambda i, j: (i, 0)),      # x row tile
                pl.BlockSpec((nf, tn), lambda i, j: (0, j)),      # weight N-tile
                pl.BlockSpec((1, tn), lambda i, j: (0, j)),       # bias slice
            ],
            out_specs=pl.BlockSpec((tm, tn), lambda i, j: (i, j)),
        )

    out = pl.pallas_call(
        kernel,
        out_shape=jax.ShapeDtypeStruct((Mp, TWp), out_dtype),
        grid_spec=grid_spec,
        compiler_params=compiler_params,
        cost_estimate=cost,
    )(x_flat, w_t, b2)

    if Mp != M or TWp != tw:
        out = out[:M, :tw]
    return out.reshape(B, n_vars, tw)


def flatten_head(x, weight, bias, *, compute_dtype=None, **kw):
    """Convenience path. In a real model, hoist prepare_flatten_head_params()
    to parameter-load time so the transpose/pad/cast is not paid per call."""
    params = prepare_flatten_head_params(weight, bias, compute_dtype=compute_dtype)
    return flatten_head_forward(x, params, compute_dtype=compute_dtype, **kw)


def _ref_forward(x, weight, bias):
    B, n_vars, d_model, patch_num = x.shape
    x_flat = x.reshape(B, n_vars, d_model * patch_num)
    return jnp.einsum("bvn,tn->bvt", x_flat, weight) + bias


if __name__ == "__main__":
    # Small shapes consistent with the module: nf = d_model * patch_num.
    B, n_vars, d_model, patch_num = 2, 4, 16, 8
    nf = d_model * patch_num            # 128
    target_window = 32

    key = jax.random.PRNGKey(0)
    kx, kw, kb = jax.random.split(key, 3)

    x = jax.random.normal(kx, (B, n_vars, d_model, patch_num), dtype=jnp.float32)
    # Deterministic synthetic Linear params (PyTorch Linear weight shape: [TW, nf]).
    weight = jax.random.normal(kw, (target_window, nf), dtype=jnp.float32) * 0.05
    bias = jax.random.normal(kb, (target_window,), dtype=jnp.float32) * 0.05
    # Dropout(head_dropout=0) is identity in eval; nothing to implement.

    y_ref = _ref_forward(x, weight, bias)

    # f32 operand path (exact against the reference). Params prepared once.
    params_f32 = prepare_flatten_head_params(weight, bias)
    y = jax.block_until_ready(flatten_head_forward(x, params_f32))
    assert y.shape == (B, n_vars, target_window)
    assert jnp.allclose(y, y_ref, atol=1e-4, rtol=1e-4)

    # bf16 operands / f32 accumulation: weight cast once at prep time,
    # activations cast per-tile inside the kernel (no extra HBM pass).
    params_bf16 = prepare_flatten_head_params(weight, bias, compute_dtype=jnp.bfloat16)
    y_bf16 = jax.block_until_ready(
        flatten_head_forward(x, params_bf16, compute_dtype=jnp.bfloat16))
    assert y_bf16.shape == (B, n_vars, target_window)
    assert jnp.allclose(y_bf16, y_ref, atol=3e-2, rtol=3e-2)

    print("KERNEL_OK")
</pallas_src>

<mosaic_0001>
module attributes {stable_mosaic.version = 11 : i64} {
  func.func @_head_kernel_single_k(%arg0: i32, %arg1: i32, %arg2: memref<8x128xf32, #tpu.memory_space<vmem>>, %arg3: memref<128x128xf32, #tpu.memory_space<vmem>>, %arg4: memref<1x128xf32, #tpu.memory_space<vmem>>, %arg5: memref<8x128xf32, #tpu.memory_space<vmem>>) attributes {dimension_semantics = [#tpu.dimension_semantics<parallel>, #tpu.dimension_semantics<parallel>], iteration_bounds = array<i64: 1, 1>, scalar_prefetch = 0 : i64, scratch_operands = 0 : i64, tpu.core_type = #tpu.core_type<tc>, window_params = [{transform_indices = @transform_0, window_bounds = array<i64: 8, 128>}, {transform_indices = @transform_1, window_bounds = array<i64: 128, 128>}, {transform_indices = @transform_2, window_bounds = array<i64: 1, 128>}, {transform_indices = @transform_3, window_bounds = array<i64: 8, 128>}]} {
    %c0 = arith.constant 0 : index
    %c0_0 = arith.constant 0 : index
    %0 = vector.load %arg2[%c0, %c0_0] : memref<8x128xf32, #tpu.memory_space<vmem>>, vector<8x128xf32>
    %c0_1 = arith.constant 0 : index
    %c0_2 = arith.constant 0 : index
    %1 = vector.load %arg3[%c0_1, %c0_2] : memref<128x128xf32, #tpu.memory_space<vmem>>, vector<128x128xf32>
    %cst = arith.constant dense<0.000000e+00> : vector<8x128xf32>
    %2 = tpu.matmul %0, %1, %cst {dimension_numbers = #tpu.dot_dimension_numbers<[1], [0], [0], [1], [0, 0, 1, 1], [], []>} : vector<8x128xf32>, vector<128x128xf32>, vector<8x128xf32> -> vector<8x128xf32>
    %c0_3 = arith.constant 0 : index
    %c0_4 = arith.constant 0 : index
    %3 = vector.load %arg4[%c0_3, %c0_4] : memref<1x128xf32, #tpu.memory_space<vmem>>, vector<1x128xf32>
    %4 = vector.broadcast %3 : vector<1x128xf32> to vector<8x128xf32>
    %5 = arith.addf %2, %4 : vector<8x128xf32>
    %c0_5 = arith.constant 0 : index
    %c0_6 = arith.constant 0 : index
    %6 = vector.load %arg5[%c0_5, %c0_6] : memref<8x128xf32, #tpu.memory_space<vmem>>, vector<8x128xf32>
    tpu.vector_store %arg5[%c0_5, %c0_6], %5 {strides = array<i32>} : memref<8x128xf32, #tpu.memory_space<vmem>>, vector<8x128xf32>,
    return
  }
  func.func @transform_0(%arg0: i32, %arg1: i32) -> (i32, i32) {
    %c0_i32 = arith.constant 0 : i32
    %c0_i32_0 = arith.constant 0 : i32
    return %arg0, %c0_i32 : i32, i32
  }
  func.func @transform_1(%arg0: i32, %arg1: i32) -> (i32, i32) {
    %c0_i32 = arith.constant 0 : i32
    %c0_i32_0 = arith.constant 0 : i32
    return %c0_i32, %arg1 : i32, i32
  }
  func.func @transform_2(%arg0: i32, %arg1: i32) -> (i32, i32) {
    %c0_i32 = arith.constant 0 : i32
    %c0_i32_0 = arith.constant 0 : i32
    return %c0_i32, %arg1 : i32, i32
  }
  func.func @transform_3(%arg0: i32, %arg1: i32) -> (i32, i32) {
    %c0_i32 = arith.constant 0 : i32
    return %arg0, %arg1 : i32, i32
  }
}

</mosaic_0001>

<bundles_post_ra>
// kernel: tpu_custom_call.1
= control target key start
LH: loop header
LB: loop body
LE: loop exit
PB: predicated region body
PF: predicated region fallthrough
CT: control target
= control target key end

     0   :  { %8 = vsyncpa [#allocation3], 0  ;;  %s226_s0 = inlined_call_operand.hbm [shape: f32[8,128], index: 0, kind: input, shape index: {}]   ;;  %s227_s1 = inlined_call_operand.hbm [shape: f32[128,128], index: 1, kind: input, shape index: {}]   ;;  %s228_s2 = inlined_call_operand.vmem [shape: f32[1,128], index: 2, kind: input, shape index: {}]   ;;  %s229_s3 = inlined_call_operand.hbm [shape: f32[8,128], index: 3, kind: output, shape index: {}]  }
   0x1   :  { %9 = vsyncpa [#allocation6], 0 }
   0x2   :  { %10 = vsyncpa [#allocation4], 0  ;;  %s16_s14 = sshll.u32 %s226_s0, 4  ;;  %s189_s15 = smov [#allocation2]   ;;  %s17_s14 = int_to_ptr.hbm [resolvable:$true] %s16_s14 }
   0x3   :  { %s18_s16 = sshll.u32 %s189_s15, 4  ;;  %s26_s19 = sshll.u32 %s227_s1, 4  ;;  %s19_s16 = int_to_ptr.vmem [resolvable:$true] %s18_s16  ;;  %s27_s19 = int_to_ptr.hbm [resolvable:$true] %s26_s19 }
   0x4   :  { %21 = dma.hbm_to_vmem [thread:$0]  %s17_s14, 128, %s19_s16, [#allocation3]  }
   0x5   :  { %s190_s20 = smov [#allocation5]   ;;  %s191_s22 = smov 128  }
   0x6   :  { %s28_s21 = sshll.u32 %s190_s20, 4  ;;  %s192_s23 = smov 8   ;;  %s29_s21 = int_to_ptr.vmem [resolvable:$true] %s28_s21 }
   0x7   :  { %34 = dma.hbm_to_vmem [thread:$0]  %s27_s19, 2048, %s29_s21, [#allocation6], %s191_s22, %s191_s22, %s192_s23  }
   0x8   :  { %183 = dma.done.wait [#allocation3], 128  }
   0x9   :  { %184 = vsyncadd [#allocation3], 4294967168 }
   0xa   :  { %185 = dma.done.wait [#allocation6], 2048  }
   0xb   :  { %186 = vsyncadd [#allocation6], 4294965248  ;;  %v61_v0 = vld [vmem:[#allocation5 + $0x78] sm:$0xff]  ;;  %v60_v1 = vld [vmem:[#allocation5 + $0x70] sm:$0xff]  ;;  %s193_s24 = smov [#allocation7]   ;;  %s94_s28 = sshll.u32 %s229_s3, 4  ;;  %s95_s28 = int_to_ptr.hbm [resolvable:$true] %s94_s28 }
   0xc   :  { %66 = vmatpush.msra.mxu0 %v61_v0  ;;  %v59_v2 = vld [vmem:[#allocation5 + $0x68] sm:$0xff]  ;;  %v58_v3 = vld [vmem:[#allocation5 + $0x60] sm:$0xff]  ;;  %v57_v4 = vld [vmem:[#allocation5 + $0x58] sm:$0xff]  ;;  %s92_s25 = sshll.u32 %s193_s24, 4  ;;  %s93_s25 = int_to_ptr.vmem [resolvable:$true] %s92_s25 }
   0xd   :  { %v56_v5 = vld [vmem:[#allocation5 + $0x50] sm:$0xff]  ;;  %v55_v6 = vld [vmem:[#allocation5 + $0x48] sm:$0xff]  ;;  %v54_v7 = vld [vmem:[#allocation5 + $0x40] sm:$0xff] }
   0xe   :  { %67 = vmatpush.msra.mxu0 %v60_v1  ;;  %v53_v8 = vld [vmem:[#allocation5 + $0x38] sm:$0xff]  ;;  %v52_v9 = vld [vmem:[#allocation5 + $0x30] sm:$0xff]  ;;  %v51_v10 = vld [vmem:[#allocation5 + $0x28] sm:$0xff] }
   0xf   :  { %v50_v11 = vld [vmem:[#allocation5 + $0x20] sm:$0xff]  ;;  %v49_v12 = vld [vmem:[#allocation5 + $0x18] sm:$0xff]  ;;  %v48_v13 = vld [vmem:[#allocation5 + $0x10] sm:$0xff] }
  0x10   :  { %68 = vmatpush.msra.mxu0 %v59_v2  ;;  %v47_v14 = vld [vmem:[#allocation5 + $0x8] sm:$0xff]  ;;  %v46_v15 = vld [vmem:[#allocation5] sm:$0xff]  ;;  %v45_v16 = vld [vmem:[#allocation2] sm:$0xff] }
  0x11   :  { %v110_v17 = vld [vmem:[%s228_s2] ss:$0 sm:$0xff] }
  0x12   :  { %69 = vmatpush.msra.mxu0 %v58_v3 }
  0x14   :  { %70 = vmatpush.msra.mxu0 %v57_v4 }
  0x16   :  { %71 = vmatpush.msra.mxu0 %v56_v5 }
  0x18   :  { %72 = vmatpush.msra.mxu0 %v55_v6 }
  0x1a   :  { %73 = vmatpush.msra.mxu0 %v54_v7 }
  0x1c   :  { %74 = vmatpush.msra.mxu0 %v53_v8 }
  0x1e   :  { %75 = vmatpush.msra.mxu0 %v52_v9 }
  0x20   :  { %76 = vmatpush.msra.mxu0 %v51_v10 }
  0x22   :  { %77 = vmatpush.msra.mxu0 %v50_v11 }
  0x24   :  { %78 = vmatpush.msra.mxu0 %v49_v12 }
  0x26   :  { %79 = vmatpush.msra.mxu0 %v48_v13 }
  0x28   :  { %80 = vmatpush.msra.mxu0 %v47_v14 }
  0x2a   :  { %81 = vmatpush.msra.mxu0 %v46_v15 }
  0x2b   :  { %82 = vmatmul.f32.vlgmr.msra.gmra.mxu0 %v45_v16 }
  0xa8   :  { %v83_v18 = vpop.f32.mrf.mxu0 }
  0xa9   :  { %v84_v19 = vadd.f32 %v110_v17, %v83_v18 }
  0xab   :  { %86 = vst [vmem:[#allocation7] sm:$0xff] %v84_v19 }
  0xac   :  { %97 = dma.vmem_to_hbm [thread:$0]  %s93_s25, 128, %s95_s28, [#allocation4]  }
  0xad   :  { %187 = dma.done.wait [#allocation4], 128  }
  0xae   :  { %188 = vsyncadd [#allocation4], 4294967168 }
  0xaf   :  { %102 = vsyncpa [#allocation3], 1 }
  0xb0   :  { %103 = vsyncpa [#allocation6], 1 }
  0xb1   :  { %104 = vsyncpa [#allocation4], 1 }

</bundles_post_ra>
